<compile_context>
chip_gen: v5e
topology: v5e:2x2
jax: 0.10.0
libtpu: 0.0.40
codegen_flags: <defaults>
</compile_context>

<pallas_src>
import jax
import jax.numpy as jnp
from jax.experimental import pallas as pl
from jax.experimental.pallas import tpu as pltpu

STATE_SIZE = 4        # CartPole-v1 observation size
HIDDEN = 24
ACTION_SIZE = 2       # CartPole-v1 action count

F_PAD = 32            # padded output-feature rows (multiple of 8, >= HIDDEN)
K1_PAD = 8            # padded layer-1 contraction dim (>= STATE_SIZE, sublane multiple)
LANE = 128
BATCH_TILE = 8192     # max lanes per grid step (per-step footprint << scoped VMEM)


def _cdiv(a, b):
    return -(-a // b)


def _round_up(n, m):
    return _cdiv(n, m) * m


# ---------------------------------------------------------------------------
# Kernel: three MXU matmuls + VPU bias/ReLU tails, feature-major activations.
# ---------------------------------------------------------------------------
def qnetwork_kernel(x_ref, w1_ref, w23_ref, b_ref, o_ref):
    # x: (K1_PAD, tile) lane-dense; rows >= STATE_SIZE are exact zeros.
    x = x_ref[...]

    # Layer 1: (32, 8) @ (8, tile) on the MXU, f32 accumulate.
    h1 = jnp.dot(w1_ref[...], x, preferred_element_type=jnp.float32) + b_ref[0]
    h1 = jnp.maximum(h1, 0.0)            # rows >= HIDDEN stay exactly 0

    # Layer 2: (32, 32) @ (32, tile).
    h2 = jnp.dot(w23_ref[0], h1, preferred_element_type=jnp.float32) + b_ref[1]
    h2 = jnp.maximum(h2, 0.0)

    # Layer 3 (no ReLU): (32, 32) @ (32, tile); only rows [:ACTION_SIZE] are real.
    y = jnp.dot(w23_ref[1], h2, preferred_element_type=jnp.float32) + b_ref[2]

    # Lane-dense store of just the ACTION_SIZE real rows.
    o_ref[...] = y[:ACTION_SIZE, :]


# ---------------------------------------------------------------------------
# Tiling policy: big tiles, but >= 2 parallel grid steps whenever splittable
# (uses both TensorCores on v7x; harmless on v5e/v6e).
# ---------------------------------------------------------------------------
def batch_tiling(batch):
    """Return (tile, grid_n); padded batch = tile * grid_n."""
    b = _round_up(max(batch, 1), LANE)
    if b <= LANE:
        return b, 1
    grid_n = max(2, _cdiv(b, BATCH_TILE))
    tile = _round_up(_cdiv(b, grid_n), LANE)
    return tile, grid_n


def qnetwork_forward_fm(x_fm, w1p, w23p, bp, *, tile, grid_n):
    """Feature-major path. x_fm: (K1_PAD, tile*grid_n) f32, batch on lanes.

    Returns (ACTION_SIZE, tile*grid_n) f32, feature-major.
    """
    b_pad = tile * grid_n
    return pl.pallas_call(
        qnetwork_kernel,
        out_shape=jax.ShapeDtypeStruct((ACTION_SIZE, b_pad), jnp.float32),
        grid=(grid_n,),
        in_specs=[
            pl.BlockSpec((K1_PAD, tile), lambda i: (0, i)),        # x tile
            pl.BlockSpec((F_PAD, K1_PAD), lambda i: (0, 0)),       # W1 (resident)
            pl.BlockSpec((2, F_PAD, F_PAD), lambda i: (0, 0, 0)),  # W2, W3 (resident)
            pl.BlockSpec((3, F_PAD, 1), lambda i: (0, 0, 0)),      # biases (resident)
        ],
        out_specs=pl.BlockSpec((ACTION_SIZE, tile), lambda i: (0, i)),
        compiler_params=pltpu.CompilerParams(
            dimension_semantics=("parallel",)),
    )(x_fm, w1p, w23p, bp)


def qnetwork_forward(x, w1p, w23p, bp):
    """x: (B, STATE_SIZE) float32 -> (B, ACTION_SIZE) float32.

    Convenience wrapper: pads/transposes to feature-major.  For B <= ~128 the
    wall time is launch-latency bound; keeping states feature-major upstream
    (and only transposing the tiny (2, B) output) removes the extra pass.
    """
    B = x.shape[0]
    tile, grid_n = batch_tiling(B)
    b_pad = tile * grid_n

    x_fm = jnp.zeros((K1_PAD, b_pad), jnp.float32)
    x_fm = x_fm.at[:STATE_SIZE, :B].set(x.astype(jnp.float32).T)

    out_fm = qnetwork_forward_fm(x_fm, w1p, w23p, bp, tile=tile, grid_n=grid_n)
    return out_fm[:, :B].T


# ---------------------------------------------------------------------------
# Parameter init / packing / reference
# ---------------------------------------------------------------------------
def init_params(key):
    """Deterministic init mimicking nn.Linear: W (out, in), uniform(+-1/sqrt(fan_in))."""
    def linear(k, fan_in, fan_out):
        kw, kb = jax.random.split(k)
        bound = 1.0 / jnp.sqrt(float(fan_in))
        w = jax.random.uniform(kw, (fan_out, fan_in), jnp.float32, -bound, bound)
        b = jax.random.uniform(kb, (fan_out,), jnp.float32, -bound, bound)
        return w, b

    k1, k2, k3 = jax.random.split(key, 3)
    w1, b1 = linear(k1, STATE_SIZE, HIDDEN)
    w2, b2 = linear(k2, HIDDEN, HIDDEN)
    w3, b3 = linear(k3, HIDDEN, ACTION_SIZE)
    return {"w1": w1, "b1": b1, "w2": w2, "b2": b2, "w3": w3, "b3": b3}


def pack_params(params):
    """Zero-pad weights/biases into MXU-friendly buffers.

    Returns (w1p (F_PAD,K1_PAD), w23p (2,F_PAD,F_PAD), bp (3,F_PAD,1)).
    Padded rows/cols are exact zeros, so padded hidden rows stay 0 after ReLU.
    """
    w1p = jnp.zeros((F_PAD, K1_PAD), jnp.float32)
    w1p = w1p.at[:HIDDEN, :STATE_SIZE].set(params["w1"])

    w23p = jnp.zeros((2, F_PAD, F_PAD), jnp.float32)
    w23p = w23p.at[0, :HIDDEN, :HIDDEN].set(params["w2"])
    w23p = w23p.at[1, :ACTION_SIZE, :HIDDEN].set(params["w3"])

    bp = jnp.zeros((3, F_PAD, 1), jnp.float32)
    bp = bp.at[0, :HIDDEN, 0].set(params["b1"])
    bp = bp.at[1, :HIDDEN, 0].set(params["b2"])
    bp = bp.at[2, :ACTION_SIZE, 0].set(params["b3"])
    return w1p, w23p, bp


def qnetwork_ref(x, params):
    h1 = jnp.maximum(x @ params["w1"].T + params["b1"], 0.0)
    h2 = jnp.maximum(h1 @ params["w2"].T + params["b2"], 0.0)
    return h2 @ params["w3"].T + params["b3"]


if __name__ == "__main__":
    key = jax.random.PRNGKey(0)
    kp, kx1, kx2 = jax.random.split(key, 3)
    params = init_params(kp)
    w1p, w23p, bp = pack_params(params)

    # Tolerance covers possible multi-/single-pass bf16 lowering of f32 MXU
    # matmuls (per perf-review correctness_concerns); outputs are O(0.1-1).
    TOL = 2e-2

    # Small batch: single 128-lane tile (acting path).
    x_small = jax.random.normal(kx1, (8, STATE_SIZE), jnp.float32)
    out_small = jax.block_until_ready(qnetwork_forward(x_small, w1p, w23p, bp))
    ref_small = qnetwork_ref(x_small, params)
    assert out_small.shape == (8, ACTION_SIZE)
    assert jnp.allclose(out_small, ref_small, atol=TOL, rtol=TOL), \
        "small-batch mismatch vs JAX reference"

    # Larger batch: >= 2 'parallel' grid steps (dual-TC on v7x), resident params.
    x_big = jax.random.normal(kx2, (2048, STATE_SIZE), jnp.float32)
    out_big = jax.block_until_ready(qnetwork_forward(x_big, w1p, w23p, bp))
    ref_big = qnetwork_ref(x_big, params)
    assert out_big.shape == (2048, ACTION_SIZE)
    assert jnp.allclose(out_big, ref_big, atol=TOL, rtol=TOL), \
        "large-batch mismatch vs JAX reference"

    print("KERNEL_OK")
</pallas_src>

<mosaic_0001>
module attributes {stable_mosaic.version = 11 : i64} {
  func.func @qnetwork_kernel(%arg0: i32, %arg1: memref<8x128xf32, #tpu.memory_space<vmem>>, %arg2: memref<32x8xf32, #tpu.memory_space<vmem>>, %arg3: memref<2x32x32xf32, #tpu.memory_space<vmem>>, %arg4: memref<3x32x1xf32, #tpu.memory_space<vmem>>, %arg5: memref<2x128xf32, #tpu.memory_space<vmem>>) attributes {dimension_semantics = [#tpu.dimension_semantics<parallel>], iteration_bounds = array<i64: 1>, scalar_prefetch = 0 : i64, scratch_operands = 0 : i64, tpu.core_type = #tpu.core_type<tc>, window_params = [{transform_indices = @transform_0, window_bounds = array<i64: 8, 128>}, {pipeline_mode = #tpu.pipeline_mode<synchronous>, transform_indices = @transform_1, window_bounds = array<i64: 32, 8>}, {pipeline_mode = #tpu.pipeline_mode<synchronous>, transform_indices = @transform_2, window_bounds = array<i64: 2, 32, 32>}, {pipeline_mode = #tpu.pipeline_mode<synchronous>, transform_indices = @transform_3, window_bounds = array<i64: 3, 32, 1>}, {transform_indices = @transform_4, window_bounds = array<i64: 2, 128>}]} {
    %c0 = arith.constant 0 : index
    %c0_0 = arith.constant 0 : index
    %0 = vector.load %arg1[%c0, %c0_0] : memref<8x128xf32, #tpu.memory_space<vmem>>, vector<8x128xf32>
    %c0_1 = arith.constant 0 : index
    %c0_2 = arith.constant 0 : index
    %1 = vector.load %arg2[%c0_1, %c0_2] : memref<32x8xf32, #tpu.memory_space<vmem>>, vector<32x8xf32>
    %cst = arith.constant dense<0.000000e+00> : vector<32x128xf32>
    %2 = tpu.matmul %1, %0, %cst {dimension_numbers = #tpu.dot_dimension_numbers<[1], [0], [0], [1], [0, 0, 1, 1], [], []>} : vector<32x8xf32>, vector<8x128xf32>, vector<32x128xf32> -> vector<32x128xf32>
    %c0_3 = arith.constant 0 : index
    %c0_4 = arith.constant 0 : index
    %c0_5 = arith.constant 0 : index
    %3 = vector.load %arg4[%c0_3, %c0_4, %c0_5] : memref<3x32x1xf32, #tpu.memory_space<vmem>>, vector<1x32x1xf32>
    %4 = vector.shape_cast %3 : vector<1x32x1xf32> to vector<32x1xf32>
    %5 = vector.broadcast %4 : vector<32x1xf32> to vector<32x128xf32>
    %6 = arith.addf %2, %5 : vector<32x128xf32>
    %cst_6 = arith.constant 0.000000e+00 : f32
    %7 = vector.broadcast %cst_6 : f32 to vector<32x128xf32>
    %8 = arith.maximumf %6, %7 : vector<32x128xf32>
    %c0_7 = arith.constant 0 : index
    %c0_8 = arith.constant 0 : index
    %c0_9 = arith.constant 0 : index
    %9 = vector.load %arg3[%c0_7, %c0_8, %c0_9] : memref<2x32x32xf32, #tpu.memory_space<vmem>>, vector<1x32x32xf32>
    %10 = vector.shape_cast %9 : vector<1x32x32xf32> to vector<32x32xf32>
    %cst_10 = arith.constant dense<0.000000e+00> : vector<32x128xf32>
    %11 = tpu.matmul %10, %8, %cst_10 {dimension_numbers = #tpu.dot_dimension_numbers<[1], [0], [0], [1], [0, 0, 1, 1], [], []>} : vector<32x32xf32>, vector<32x128xf32>, vector<32x128xf32> -> vector<32x128xf32>
    %c1 = arith.constant 1 : index
    %c0_11 = arith.constant 0 : index
    %c0_12 = arith.constant 0 : index
    %12 = vector.load %arg4[%c1, %c0_11, %c0_12] : memref<3x32x1xf32, #tpu.memory_space<vmem>>, vector<1x32x1xf32>
    %13 = vector.shape_cast %12 : vector<1x32x1xf32> to vector<32x1xf32>
    %14 = vector.broadcast %13 : vector<32x1xf32> to vector<32x128xf32>
    %15 = arith.addf %11, %14 : vector<32x128xf32>
    %cst_13 = arith.constant 0.000000e+00 : f32
    %16 = vector.broadcast %cst_13 : f32 to vector<32x128xf32>
    %17 = arith.maximumf %15, %16 : vector<32x128xf32>
    %c1_14 = arith.constant 1 : index
    %c0_15 = arith.constant 0 : index
    %c0_16 = arith.constant 0 : index
    %18 = vector.load %arg3[%c1_14, %c0_15, %c0_16] : memref<2x32x32xf32, #tpu.memory_space<vmem>>, vector<1x32x32xf32>
    %19 = vector.shape_cast %18 : vector<1x32x32xf32> to vector<32x32xf32>
    %cst_17 = arith.constant dense<0.000000e+00> : vector<32x128xf32>
    %20 = tpu.matmul %19, %17, %cst_17 {dimension_numbers = #tpu.dot_dimension_numbers<[1], [0], [0], [1], [0, 0, 1, 1], [], []>} : vector<32x32xf32>, vector<32x128xf32>, vector<32x128xf32> -> vector<32x128xf32>
    %c2 = arith.constant 2 : index
    %c0_18 = arith.constant 0 : index
    %c0_19 = arith.constant 0 : index
    %21 = vector.load %arg4[%c2, %c0_18, %c0_19] : memref<3x32x1xf32, #tpu.memory_space<vmem>>, vector<1x32x1xf32>
    %22 = vector.shape_cast %21 : vector<1x32x1xf32> to vector<32x1xf32>
    %23 = vector.broadcast %22 : vector<32x1xf32> to vector<32x128xf32>
    %24 = arith.addf %20, %23 : vector<32x128xf32>
    %25 = vector.extract_strided_slice %24 {offsets = [0, 0], sizes = [2, 128], strides = [1, 1]} : vector<32x128xf32> to vector<2x128xf32>
    %c0_20 = arith.constant 0 : index
    %c0_21 = arith.constant 0 : index
    %26 = vector.load %arg5[%c0_20, %c0_21] : memref<2x128xf32, #tpu.memory_space<vmem>>, vector<2x128xf32>
    tpu.vector_store %arg5[%c0_20, %c0_21], %25 {strides = array<i32>} : memref<2x128xf32, #tpu.memory_space<vmem>>, vector<2x128xf32>,
    return
  }
  func.func @transform_0(%arg0: i32) -> (i32, i32) {
    %c0_i32 = arith.constant 0 : i32
    %c0_i32_0 = arith.constant 0 : i32
    return %c0_i32, %arg0 : i32, i32
  }
  func.func @transform_1(%arg0: i32) -> (i32, i32) {
    %c0_i32 = arith.constant 0 : i32
    %c0_i32_0 = arith.constant 0 : i32
    %c0_i32_1 = arith.constant 0 : i32
    return %c0_i32, %c0_i32_0 : i32, i32
  }
  func.func @transform_2(%arg0: i32) -> (i32, i32, i32) {
    %c0_i32 = arith.constant 0 : i32
    %c0_i32_0 = arith.constant 0 : i32
    %c0_i32_1 = arith.constant 0 : i32
    %c0_i32_2 = arith.constant 0 : i32
    return %c0_i32, %c0_i32_0, %c0_i32_1 : i32, i32, i32
  }
  func.func @transform_3(%arg0: i32) -> (i32, i32, i32) {
    %c0_i32 = arith.constant 0 : i32
    %c0_i32_0 = arith.constant 0 : i32
    %c0_i32_1 = arith.constant 0 : i32
    %c0_i32_2 = arith.constant 0 : i32
    return %c0_i32, %c0_i32_0, %c0_i32_1 : i32, i32, i32
  }
  func.func @transform_4(%arg0: i32) -> (i32, i32) {
    %c0_i32 = arith.constant 0 : i32
    %c0_i32_0 = arith.constant 0 : i32
    return %c0_i32, %arg0 : i32, i32
  }
}

</mosaic_0001>

<bundles_post_ra>
// kernel: tpu_custom_call.1
= control target key start
LH: loop header
LB: loop body
LE: loop exit
PB: predicated region body
PF: predicated region fallthrough
CT: control target
= control target key end

     0   :  { %vm47_vm0 = vcmask 64512   ;;  %v313_v3 = vmov 0   ;;  %s421_s0 = inlined_call_operand.vmem [shape: f32[8,128], index: 0, kind: input, shape index: {}]   ;;  %s422_s1 = inlined_call_operand.vmem [shape: f32[32,8], index: 1, kind: input, shape index: {}]   ;;  %s423_s2 = inlined_call_operand.vmem [shape: f32[2,32,32], index: 2, kind: input, shape index: {}]   ;;  %s424_s3 = inlined_call_operand.vmem [shape: f32[3,32,1], index: 3, kind: input, shape index: {}]   ;;  %s425_s4 = inlined_call_operand.hbm [shape: f32[2,128], index: 4, kind: output, shape index: {}]  }
   0x1   :  { %v18_v0 = vld [vmem:[%s421_s0] sm:$0xff]  ;;  %v24_v2 = vld [vmem:[%s424_s3 + $0x8] sm:$0xff]  ;;  %285 = vset.pattern.permute.xlu1 %v313_v3  ;;  %v26_v4 = vld [vmem:[%s424_s3 + $0x18] sm:$0xff]  ;;  %284 = vset.pattern.permute.xlu0 %v313_v3 }
   0x2   :  { %v19_v1 = vld [vmem:[%s422_s1] sm:$0xff]  ;;  %75 = vmatpush.msra.mxu0 %v18_v0  ;;  %34 = vperm.xlu1 %285, %v24_v2  }
   0x3   :  { %250 = vmatmul.msk.f32.vlgmr.msra.gmra.mxu0 %vm47_vm0, %v19_v1  ;;  %286 = vset.pattern.permute.xlu2 %v313_v3 }
   0x4   :  { %9 = vsyncpa [#allocation3], 0  ;;  %44 = vperm.xlu0 %284, %v26_v4   ;;  %v20_v5 = vld [vmem:[%s422_s1 + $0x8] sm:$0xff]  ;;  %v23_v6 = vld [vmem:[%s424_s3] sm:$0xff]  ;;  %vm122_vm1 = vcmask 261120   ;;  %s314_s29 = smov [#allocation2]  }
   0x5   :  { %v25_v7 = vld [vmem:[%s424_s3 + $0x10] sm:$0xff]  ;;  %v254_v9 = vld [vmem:[%s424_s3 + $0x20] sm:$0xff]  ;;  %v255_v10 = vld [vmem:[%s424_s3 + $0x28] sm:$0xff]  ;;  %s239_s30 = sshll.u32 %s314_s29, 4  ;;  %s241_s7 = sshll.u32 %s425_s4, 4  ;;  %s240_s30 = int_to_ptr.vmem [resolvable:$true] %s239_s30  ;;  %s242_s7 = int_to_ptr.hbm [resolvable:$true] %s241_s7 }
   0x6   :  { %v21_v8 = vld [vmem:[%s422_s1 + $0x10] sm:$0xff]  ;;  %v22_v11 = vld [vmem:[%s422_s1 + $0x18] sm:$0xff]  ;;  %v93_v30 = vld [vmem:[%s423_s2] sm:$0xff] }
   0x7   :  { %v257_v17 = vld [vmem:[%s424_s3 + $0x38] sm:$0xff]  ;;  %v256_v25 = vld [vmem:[%s424_s3 + $0x30] sm:$0xff]  ;;  %v94_v31 = vld [vmem:[%s423_s2 + $0x8] sm:$0xff] }
   0x8   :  { %119 = vperm.xlu2 %286, %v257_v17   ;;  %v266_v32 = vld [vmem:[%s424_s3 + $0x40] sm:$0xff]  ;;  %v95_v33 = vld [vmem:[%s423_s2 + $0x10] sm:$0xff]  ;;  %v96_v34 = vld [vmem:[%s423_s2 + $0x18] sm:$0xff] }
   0x9   :  { %v262_v51 = vld [vmem:[%s423_s2 + $0x20] sm:$0xff]  ;;  %v263_v52 = vld [vmem:[%s423_s2 + $0x28] sm:$0xff]  ;;  %v264_v53 = vld [vmem:[%s423_s2 + $0x30] sm:$0xff] }
   0xa   :  { %29 = vperm.xlu1 %285, %v23_v6   ;;  %v265_v54 = vld [vmem:[%s423_s2 + $0x38] sm:$0xff] }
   0xb   :  { %251 = vmatmul.msk.f32.gmra.mxu0 %vm47_vm0, %v20_v5 }
   0xc   :  { %39 = vperm.xlu0 %284, %v25_v7  }
  0x10   :  { %114 = vperm.xlu2 %286, %v256_v25  }
  0x12   :  { %104 = vperm.xlu1 %285, %v254_v9  }
  0x13   :  { %252 = vmatmul.msk.f32.gmra.mxu0 %vm47_vm0, %v21_v8 }
  0x14   :  { %109 = vperm.xlu0 %284, %v255_v10  }
  0x18   :  { %180 = vperm.xlu2 %286, %v266_v32  }
  0x1b   :  { %253 = vmatmul.msk.f32.gmra.mxu0 %vm47_vm0, %v22_v11 }
  0x62   :  { %v120_v36 = vpop.permute.xlu2 %119 }
  0x6a   :  { %v115_v38 = vpop.permute.xlu2 %114 }
  0x72   :  { %v181_v55 = vpop.permute.xlu2 %180 }
  0x74   :  { %v35_v15 = vpop.permute.xlu1 %34 }
  0x76   :  { %v45_v14 = vpop.permute.xlu0 %44 }
  0x7c   :  { %v30_v22 = vpop.permute.xlu1 %29 }
  0x7e   :  { %v40_v18 = vpop.permute.xlu0 %39 }
  0x80   :  { %v77_v12 = vpop.f32.mrf.mxu0 }
  0x81   :  { %v78_v26 = vadd.f32 %v77_v12, %v30_v22 }
  0x83   :  { %v89_v29 = vmax.f32 %v78_v26, 0.0 }
  0x84   :  { %v105_v46 = vpop.permute.xlu1 %104 }
  0x86   :  { %v110_v42 = vpop.permute.xlu0 %109 }
  0x88   :  { %v80_v13 = vpop.f32.mrf.mxu0 }
  0x89   :  { %v81_v23 = vadd.f32 %v80_v13, %v35_v15 }
  0x8b   :  { %v90_v28 = vmax.f32 %v81_v23, 0.0 }
  0x90   :  { %v83_v16 = vpop.f32.mrf.mxu0 }
  0x91   :  { %v84_v20 = vadd.f32 %v83_v16, %v40_v18 }
  0x93   :  { %v91_v27 = vmax.f32 %v84_v20, 0.0 }
  0x98   :  { %v86_v19 = vpop.f32.mrf.mxu0 }
  0x99   :  { %v87_v21 = vadd.f32 %v86_v19, %v45_v14 }
  0x9b   :  { %v92_v24 = vmax.f32 %v87_v21, 0.0 }
  0x9d   :  { %147 = vmatpush.msra.mxu1 %v92_v24  ;;  %274 = vmatpush.msra.mxu3 %v92_v24 }
  0x9f   :  { %148 = vmatpush.msra.mxu1 %v91_v27  ;;  %275 = vmatpush.msra.mxu3 %v91_v27 }
  0xa1   :  { %149 = vmatpush.msra.mxu1 %v90_v28  ;;  %276 = vmatpush.msra.mxu3 %v90_v28 }
  0xa3   :  { %150 = vmatpush.msra.mxu1 %v89_v29  ;;  %277 = vmatpush.msra.mxu3 %v89_v29 }
  0xa4   :  { %258 = vmatmul.msk.f32.vlgmr.msra.gmra.mxu1 %vm122_vm1, %v93_v30  ;;  %259 = vmatmul.msk.f32.vlgmr.msra.gmra.mxu3 %vm122_vm1, %v94_v31 }
  0xac   :  { %260 = vmatmul.msk.f32.gmra.mxu3 %vm122_vm1, %v95_v33 }
  0xb4   :  { %261 = vmatmul.msk.f32.gmra.mxu3 %vm122_vm1, %v96_v34 }
 0x121   :  { %v152_v43 = vpop.f32.mrf.mxu1 }
 0x122   :  { %v153_v47 = vadd.f32 %v152_v43, %v105_v46 }
 0x124   :  { %v164_v50 = vmax.f32 %v153_v47, 0.0 }
 0x127   :  { %v155_v35 = vpop.f32.mrf.mxu3 }
 0x128   :  { %v156_v44 = vadd.f32 %v155_v35, %v110_v42 }
 0x12a   :  { %v165_v49 = vmax.f32 %v156_v44, 0.0 }
 0x12f   :  { %v158_v37 = vpop.f32.mrf.mxu3 }
 0x130   :  { %v159_v40 = vadd.f32 %v158_v37, %v115_v38 }
 0x132   :  { %v166_v48 = vmax.f32 %v159_v40, 0.0 }
 0x137   :  { %v161_v39 = vpop.f32.mrf.mxu3 }
 0x138   :  { %v162_v41 = vadd.f32 %v161_v39, %v120_v36 }
 0x13a   :  { %v167_v45 = vmax.f32 %v162_v41, 0.0 }
 0x13c   :  { %219 = vmatpush.msrb.mxu1 %v167_v45  ;;  %278 = vmatpush.msra.mxu2 %v167_v45 }
 0x13e   :  { %220 = vmatpush.msrb.mxu1 %v166_v48  ;;  %279 = vmatpush.msra.mxu2 %v166_v48 }
 0x140   :  { %221 = vmatpush.msrb.mxu1 %v165_v49  ;;  %280 = vmatpush.msra.mxu2 %v165_v49 }
 0x142   :  { %222 = vmatpush.msrb.mxu1 %v164_v50  ;;  %281 = vmatpush.msra.mxu2 %v164_v50 }
 0x143   :  { %270 = vmatmul.msk.f32.vlgmr.msrb.gmra.mxu1 %vm122_vm1, %v262_v51  ;;  %271 = vmatmul.msk.f32.vlgmr.msra.gmra.mxu2 %vm122_vm1, %v263_v52 }
 0x14b   :  { %272 = vmatmul.msk.f32.gmra.mxu2 %vm122_vm1, %v264_v53 }
 0x153   :  { %273 = vmatmul.msk.f32.gmra.mxu2 %vm122_vm1, %v265_v54 }
 0x1c0   :  { %v224_v56 = vpop.f32.mrf.mxu1 }
 0x1c1   :  { %v225_v57 = vadd.f32 %v224_v56, %v181_v55 }
 0x1c3   :  { %233 = vst [vmem:[#allocation2] sm:$0x3] %v225_v57 }
 0x1c4   :  { %244 = dma.vmem_to_hbm [thread:$0]  %s240_s30, 32, %s242_s7, [#allocation3]  }
 0x1c6   :  { %v227_v58 = vpop.f32.mrf.mxu2 }
 0x1ce   :  { %v229_v59 = vpop.f32.mrf.mxu2 }
 0x1d6   :  { %v231_v60 = vpop.f32.mrf.mxu2 }
 0x1d7   :  { %311 = dma.done.wait [#allocation3], 32  }
 0x1d8   :  { %312 = vsyncadd [#allocation3], 4294967264 }
 0x1d9   :  { %249 = vsyncpa [#allocation3], 1 }

</bundles_post_ra>
